<compile_context>
chip_gen: v5e
topology: v5e:2x2
jax: 0.10.0
libtpu: 0.0.40
codegen_flags: <defaults>
</compile_context>

<pallas_src>
import jax
import jax.numpy as jnp
from jax.experimental import pallas as pl
from jax.experimental.pallas import tpu as pltpu


def _round_up(x, m):
    return (x + m - 1) // m * m


# Hard cap on the batch tile (rows). Double-buffered pipeline traffic is
# 72 B/row and the in-kernel temporaries are a handful of (8, bb) f32 blocks,
# so bb=131072 keeps total VMEM use ~25 MiB < the 32 MiB scoped limit we
# request, on every TPU generation (incl. v5e, whose default is only 16 MiB).
_MAX_BLOCK_B = 131072


def _mlp_kernel(x_ref, w1_ref, b1_ref, w2_ref, b2_ref, w3_ref, b3_ref, o_ref):
    """One batch tile: x_ref (8, TB) -> o_ref (1, TB).

    Weights arrive pre-folded (sigmoid affine absorbed) and zero-padded to 8
    sublanes, so each layer is an unrolled VPU broadcast-FMA accumulation
    followed by a single EUP tanh. No MXU use at these tiny K/M.
    """
    # ---- layer 1: t1 = tanh(W1f @ x + b1f) --------------------------------
    w1 = w1_ref[...]                                    # (8, 8) rows=unit (6 used), cols=feature
    z1 = b1_ref[...] + w1[:, 0:1] * x_ref[pl.ds(0, 1), :]
    for k in range(1, 8):
        # (8,1) weight column x (1,TB) feature row -> (8,TB) broadcast FMA
        z1 = z1 + w1[:, k:k + 1] * x_ref[pl.ds(k, 1), :]
    t1 = jnp.tanh(z1)                                   # rows 6,7 are zero padding

    # ---- layer 2: t2 = tanh(W2f @ t1 + b2f) -------------------------------
    w2 = w2_ref[...]                                    # (8, 8) (4 used rows, 6 used cols)
    z2 = b2_ref[...] + w2[:, 0:1] * t1[0:1, :]
    for k in range(1, 6):
        z2 = z2 + w2[:, k:k + 1] * t1[k:k + 1, :]
    t2 = jnp.tanh(z2)                                   # rows 4..7 are zero padding

    # ---- layer 3: out = 0.5*tanh(W3f @ t2 + b3f) + 0.5 == sigmoid(z3) -----
    w3 = w3_ref[...]                                    # (1, 4)
    z3 = b3_ref[...] + w3[:, 0:1] * t2[0:1, :]
    for k in range(1, 4):
        z3 = z3 + w3[:, k:k + 1] * t2[k:k + 1, :]
    o_ref[...] = 0.5 * jnp.tanh(z3) + 0.5               # lane-dense (1, TB) store


def _fold_and_pad_params(params):
    """Fold the sigmoid affine into the weights at trace time and zero-pad to
    8 sublanes.

    With sigmoid(u) = 0.5*tanh(u/2) + 0.5 and a_i = 0.5*t_i + 0.5:
      layer 1:  t1 = tanh(0.5*W1 x + 0.5*b1)
      layer i>1: t_i = tanh(0.25*W_i t_{i-1} + 0.25*W_i@1 + 0.5*b_i)
      output:   sigmoid(z3) = 0.5*t3 + 0.5
    Only tiny weight tensors are touched, once, at trace time.
    """
    f32 = jnp.float32
    w1, b1 = params["w1"].astype(f32), params["b1"].astype(f32)   # (6,8), (6,1)
    w2, b2 = params["w2"].astype(f32), params["b2"].astype(f32)   # (4,6), (4,1)
    w3, b3 = params["w3"].astype(f32), params["b3"].astype(f32)   # (1,4), (1,1)

    w1f = 0.5 * w1
    b1f = 0.5 * b1
    w2f = 0.25 * w2
    b2f = 0.25 * jnp.sum(w2, axis=1, keepdims=True) + 0.5 * b2
    w3f = 0.25 * w3
    b3f = 0.25 * jnp.sum(w3, axis=1, keepdims=True) + 0.5 * b3

    w1p = jnp.zeros((8, 8), f32).at[:6, :].set(w1f)
    b1p = jnp.zeros((8, 1), f32).at[:6, :].set(b1f)
    w2p = jnp.zeros((8, 8), f32).at[:4, :6].set(w2f)
    b2p = jnp.zeros((8, 1), f32).at[:4, :].set(b2f)
    return w1p, b1p, w2p, b2p, w3f, b3f


def diabetes_classifier_forward_feature_major(xt, params, *, block_b=_MAX_BLOCK_B):
    """Core entry point. xt: (8, B) float32 feature-major (batch on lanes).
    Returns (1, B) float32 sigmoid probabilities."""
    assert xt.shape[0] == 8, "expected feature-major (8, B) input"
    B = xt.shape[1]
    w1p, b1p, w2p, b2p, w3f, b3f = _fold_and_pad_params(params)

    # Batch tile: multiple of 128 lanes; large to amortize per-step overhead,
    # capped for VMEM safety and to keep >= 4 grid steps (v7x megacore).
    bb = _round_up(max(1, min(block_b, B)), 128)
    bb = min(bb, _MAX_BLOCK_B)
    bb = min(bb, max(128, _round_up(pl.cdiv(B, 4), 128)))

    grid = (pl.cdiv(B, bb),)

    # Weights / biases: full-extent blocks with constant index_maps -> DMA'd
    # once, VMEM-resident across all grid steps.
    resident = lambda a: pl.BlockSpec(a.shape, lambda i: (0, 0))

    out = pl.pallas_call(
        _mlp_kernel,
        out_shape=jax.ShapeDtypeStruct((1, B), jnp.float32),
        grid=grid,
        in_specs=[
            pl.BlockSpec((8, bb), lambda i: (0, i)),        # streamed x tile
            resident(w1p), resident(b1p),
            resident(w2p), resident(b2p),
            resident(w3f), resident(b3f),
        ],
        out_specs=pl.BlockSpec((1, bb), lambda i: (0, i)),  # lane-dense output
        compiler_params=pltpu.CompilerParams(
            dimension_semantics=("parallel",),              # megacore on v7x
            vmem_limit_bytes=32 * 1024 * 1024,              # v5e default is 16 MiB
        ),
    )(xt, w1p, b1p, w2p, b2p, w3f, b3f)
    return out


def diabetes_classifier_forward(x, params, *, block_b=_MAX_BLOCK_B):
    """PyTorch-layout convenience wrapper. x: (B, 8) -> (B, 1).

    The transpose below is the only extra HBM pass; producers that can emit
    (8, B) should call diabetes_classifier_forward_feature_major directly.
    """
    B = x.shape[0]
    xt = x.astype(jnp.float32).T                            # (8, B)
    out = diabetes_classifier_forward_feature_major(xt, params, block_b=block_b)
    return out.reshape(B, 1)


def init_params(key):
    """PyTorch nn.Linear default init; weights (out, in), biases (out, 1)."""
    def linear(key, fan_in, fan_out):
        kw, kb = jax.random.split(key)
        bound = 1.0 / jnp.sqrt(fan_in)
        w = jax.random.uniform(kw, (fan_out, fan_in), jnp.float32, -bound, bound)
        b = jax.random.uniform(kb, (fan_out, 1), jnp.float32, -bound, bound)
        return w, b

    k1, k2, k3 = jax.random.split(key, 3)
    w1, b1 = linear(k1, 8, 6)
    w2, b2 = linear(k2, 6, 4)
    w3, b3 = linear(k3, 4, 1)
    return dict(w1=w1, b1=b1, w2=w2, b2=b2, w3=w3, b3=b3)


def reference_forward(x, p):
    """Pure-JAX reference in the PyTorch (B, features) layout."""
    h1 = jax.nn.sigmoid(x @ p["w1"].T + p["b1"].T)
    h2 = jax.nn.sigmoid(h1 @ p["w2"].T + p["b2"].T)
    return jax.nn.sigmoid(h2 @ p["w3"].T + p["b3"].T)


if __name__ == "__main__":
    key = jax.random.PRNGKey(0)
    k_params, k_x = jax.random.split(key)

    params = init_params(k_params)

    # Batch deliberately not a multiple of the tile so the masked ragged edge
    # block is exercised (no explicit padding anywhere in the wrapper).
    B = 1000
    x = jax.random.normal(k_x, (B, 8), jnp.float32)

    out = diabetes_classifier_forward(x, params)
    out = jax.block_until_ready(out)

    ref = reference_forward(x, params)
    assert out.shape == (B, 1)
    assert jnp.allclose(out, ref, atol=3e-5, rtol=1e-5), float(
        jnp.max(jnp.abs(out - ref)))

    print("KERNEL_OK")
</pallas_src>

<mosaic_0001>
module attributes {stable_mosaic.version = 11 : i64} {
  func.func @_mlp_kernel(%arg0: i32, %arg1: memref<8x256xf32, #tpu.memory_space<vmem>>, %arg2: memref<8x8xf32, #tpu.memory_space<vmem>>, %arg3: memref<8x1xf32, #tpu.memory_space<vmem>>, %arg4: memref<8x8xf32, #tpu.memory_space<vmem>>, %arg5: memref<8x1xf32, #tpu.memory_space<vmem>>, %arg6: memref<1x4xf32, #tpu.memory_space<vmem>>, %arg7: memref<1x1xf32, #tpu.memory_space<vmem>>, %arg8: memref<1x256xf32, #tpu.memory_space<vmem>>) attributes {dimension_semantics = [#tpu.dimension_semantics<parallel>], iteration_bounds = array<i64: 4>, scalar_prefetch = 0 : i64, scratch_operands = 0 : i64, tpu.core_type = #tpu.core_type<tc>, window_params = [{transform_indices = @transform_0, window_bounds = array<i64: 8, 256>}, {pipeline_mode = #tpu.pipeline_mode<synchronous>, transform_indices = @transform_1, window_bounds = array<i64: 8, 8>}, {pipeline_mode = #tpu.pipeline_mode<synchronous>, transform_indices = @transform_2, window_bounds = array<i64: 8, 1>}, {pipeline_mode = #tpu.pipeline_mode<synchronous>, transform_indices = @transform_3, window_bounds = array<i64: 8, 8>}, {pipeline_mode = #tpu.pipeline_mode<synchronous>, transform_indices = @transform_4, window_bounds = array<i64: 8, 1>}, {pipeline_mode = #tpu.pipeline_mode<synchronous>, transform_indices = @transform_5, window_bounds = array<i64: 1, 4>}, {pipeline_mode = #tpu.pipeline_mode<synchronous>, transform_indices = @transform_6, window_bounds = array<i64: 1, 1>}, {transform_indices = @transform_7, window_bounds = array<i64: 1, 256>}]} {
    %c0 = arith.constant 0 : index
    %c0_0 = arith.constant 0 : index
    %0 = vector.load %arg2[%c0, %c0_0] : memref<8x8xf32, #tpu.memory_space<vmem>>, vector<8x8xf32>
    %c0_1 = arith.constant 0 : index
    %c0_2 = arith.constant 0 : index
    %1 = vector.load %arg3[%c0_1, %c0_2] : memref<8x1xf32, #tpu.memory_space<vmem>>, vector<8x1xf32>
    %2 = vector.extract_strided_slice %0 {offsets = [0, 0], sizes = [8, 1], strides = [1, 1]} : vector<8x8xf32> to vector<8x1xf32>
    %c0_3 = arith.constant 0 : index
    %c0_4 = arith.constant 0 : index
    %3 = vector.load %arg1[%c0_3, %c0_4] : memref<8x256xf32, #tpu.memory_space<vmem>>, vector<1x256xf32>
    %4 = vector.broadcast %2 : vector<8x1xf32> to vector<8x256xf32>
    %5 = vector.broadcast %3 : vector<1x256xf32> to vector<8x256xf32>
    %6 = arith.mulf %4, %5 : vector<8x256xf32>
    %7 = vector.broadcast %1 : vector<8x1xf32> to vector<8x256xf32>
    %8 = arith.addf %7, %6 : vector<8x256xf32>
    %9 = vector.extract_strided_slice %0 {offsets = [0, 1], sizes = [8, 1], strides = [1, 1]} : vector<8x8xf32> to vector<8x1xf32>
    %c1 = arith.constant 1 : index
    %c0_5 = arith.constant 0 : index
    %10 = vector.load %arg1[%c1, %c0_5] : memref<8x256xf32, #tpu.memory_space<vmem>>, vector<1x256xf32>
    %11 = vector.broadcast %9 : vector<8x1xf32> to vector<8x256xf32>
    %12 = vector.broadcast %10 : vector<1x256xf32> to vector<8x256xf32>
    %13 = arith.mulf %11, %12 : vector<8x256xf32>
    %14 = arith.addf %8, %13 : vector<8x256xf32>
    %15 = vector.extract_strided_slice %0 {offsets = [0, 2], sizes = [8, 1], strides = [1, 1]} : vector<8x8xf32> to vector<8x1xf32>
    %c2 = arith.constant 2 : index
    %c0_6 = arith.constant 0 : index
    %16 = vector.load %arg1[%c2, %c0_6] : memref<8x256xf32, #tpu.memory_space<vmem>>, vector<1x256xf32>
    %17 = vector.broadcast %15 : vector<8x1xf32> to vector<8x256xf32>
    %18 = vector.broadcast %16 : vector<1x256xf32> to vector<8x256xf32>
    %19 = arith.mulf %17, %18 : vector<8x256xf32>
    %20 = arith.addf %14, %19 : vector<8x256xf32>
    %21 = vector.extract_strided_slice %0 {offsets = [0, 3], sizes = [8, 1], strides = [1, 1]} : vector<8x8xf32> to vector<8x1xf32>
    %c3 = arith.constant 3 : index
    %c0_7 = arith.constant 0 : index
    %22 = vector.load %arg1[%c3, %c0_7] : memref<8x256xf32, #tpu.memory_space<vmem>>, vector<1x256xf32>
    %23 = vector.broadcast %21 : vector<8x1xf32> to vector<8x256xf32>
    %24 = vector.broadcast %22 : vector<1x256xf32> to vector<8x256xf32>
    %25 = arith.mulf %23, %24 : vector<8x256xf32>
    %26 = arith.addf %20, %25 : vector<8x256xf32>
    %27 = vector.extract_strided_slice %0 {offsets = [0, 4], sizes = [8, 1], strides = [1, 1]} : vector<8x8xf32> to vector<8x1xf32>
    %c4 = arith.constant 4 : index
    %c0_8 = arith.constant 0 : index
    %28 = vector.load %arg1[%c4, %c0_8] : memref<8x256xf32, #tpu.memory_space<vmem>>, vector<1x256xf32>
    %29 = vector.broadcast %27 : vector<8x1xf32> to vector<8x256xf32>
    %30 = vector.broadcast %28 : vector<1x256xf32> to vector<8x256xf32>
    %31 = arith.mulf %29, %30 : vector<8x256xf32>
    %32 = arith.addf %26, %31 : vector<8x256xf32>
    %33 = vector.extract_strided_slice %0 {offsets = [0, 5], sizes = [8, 1], strides = [1, 1]} : vector<8x8xf32> to vector<8x1xf32>
    %c5 = arith.constant 5 : index
    %c0_9 = arith.constant 0 : index
    %34 = vector.load %arg1[%c5, %c0_9] : memref<8x256xf32, #tpu.memory_space<vmem>>, vector<1x256xf32>
    %35 = vector.broadcast %33 : vector<8x1xf32> to vector<8x256xf32>
    %36 = vector.broadcast %34 : vector<1x256xf32> to vector<8x256xf32>
    %37 = arith.mulf %35, %36 : vector<8x256xf32>
    %38 = arith.addf %32, %37 : vector<8x256xf32>
    %39 = vector.extract_strided_slice %0 {offsets = [0, 6], sizes = [8, 1], strides = [1, 1]} : vector<8x8xf32> to vector<8x1xf32>
    %c6 = arith.constant 6 : index
    %c0_10 = arith.constant 0 : index
    %40 = vector.load %arg1[%c6, %c0_10] : memref<8x256xf32, #tpu.memory_space<vmem>>, vector<1x256xf32>
    %41 = vector.broadcast %39 : vector<8x1xf32> to vector<8x256xf32>
    %42 = vector.broadcast %40 : vector<1x256xf32> to vector<8x256xf32>
    %43 = arith.mulf %41, %42 : vector<8x256xf32>
    %44 = arith.addf %38, %43 : vector<8x256xf32>
    %45 = vector.extract_strided_slice %0 {offsets = [0, 7], sizes = [8, 1], strides = [1, 1]} : vector<8x8xf32> to vector<8x1xf32>
    %c7 = arith.constant 7 : index
    %c0_11 = arith.constant 0 : index
    %46 = vector.load %arg1[%c7, %c0_11] : memref<8x256xf32, #tpu.memory_space<vmem>>, vector<1x256xf32>
    %47 = vector.broadcast %45 : vector<8x1xf32> to vector<8x256xf32>
    %48 = vector.broadcast %46 : vector<1x256xf32> to vector<8x256xf32>
    %49 = arith.mulf %47, %48 : vector<8x256xf32>
    %50 = arith.addf %44, %49 : vector<8x256xf32>
    %51 = math.tanh %50 : vector<8x256xf32>
    %c0_12 = arith.constant 0 : index
    %c0_13 = arith.constant 0 : index
    %52 = vector.load %arg4[%c0_12, %c0_13] : memref<8x8xf32, #tpu.memory_space<vmem>>, vector<8x8xf32>
    %c0_14 = arith.constant 0 : index
    %c0_15 = arith.constant 0 : index
    %53 = vector.load %arg5[%c0_14, %c0_15] : memref<8x1xf32, #tpu.memory_space<vmem>>, vector<8x1xf32>
    %54 = vector.extract_strided_slice %52 {offsets = [0, 0], sizes = [8, 1], strides = [1, 1]} : vector<8x8xf32> to vector<8x1xf32>
    %55 = vector.extract_strided_slice %51 {offsets = [0, 0], sizes = [1, 256], strides = [1, 1]} : vector<8x256xf32> to vector<1x256xf32>
    %56 = vector.broadcast %54 : vector<8x1xf32> to vector<8x256xf32>
    %57 = vector.broadcast %55 : vector<1x256xf32> to vector<8x256xf32>
    %58 = arith.mulf %56, %57 : vector<8x256xf32>
    %59 = vector.broadcast %53 : vector<8x1xf32> to vector<8x256xf32>
    %60 = arith.addf %59, %58 : vector<8x256xf32>
    %61 = vector.extract_strided_slice %52 {offsets = [0, 1], sizes = [8, 1], strides = [1, 1]} : vector<8x8xf32> to vector<8x1xf32>
    %62 = vector.extract_strided_slice %51 {offsets = [1, 0], sizes = [1, 256], strides = [1, 1]} : vector<8x256xf32> to vector<1x256xf32>
    %63 = vector.broadcast %61 : vector<8x1xf32> to vector<8x256xf32>
    %64 = vector.broadcast %62 : vector<1x256xf32> to vector<8x256xf32>
    %65 = arith.mulf %63, %64 : vector<8x256xf32>
    %66 = arith.addf %60, %65 : vector<8x256xf32>
    %67 = vector.extract_strided_slice %52 {offsets = [0, 2], sizes = [8, 1], strides = [1, 1]} : vector<8x8xf32> to vector<8x1xf32>
    %68 = vector.extract_strided_slice %51 {offsets = [2, 0], sizes = [1, 256], strides = [1, 1]} : vector<8x256xf32> to vector<1x256xf32>
    %69 = vector.broadcast %67 : vector<8x1xf32> to vector<8x256xf32>
    %70 = vector.broadcast %68 : vector<1x256xf32> to vector<8x256xf32>
    %71 = arith.mulf %69, %70 : vector<8x256xf32>
    %72 = arith.addf %66, %71 : vector<8x256xf32>
    %73 = vector.extract_strided_slice %52 {offsets = [0, 3], sizes = [8, 1], strides = [1, 1]} : vector<8x8xf32> to vector<8x1xf32>
    %74 = vector.extract_strided_slice %51 {offsets = [3, 0], sizes = [1, 256], strides = [1, 1]} : vector<8x256xf32> to vector<1x256xf32>
    %75 = vector.broadcast %73 : vector<8x1xf32> to vector<8x256xf32>
    %76 = vector.broadcast %74 : vector<1x256xf32> to vector<8x256xf32>
    %77 = arith.mulf %75, %76 : vector<8x256xf32>
    %78 = arith.addf %72, %77 : vector<8x256xf32>
    %79 = vector.extract_strided_slice %52 {offsets = [0, 4], sizes = [8, 1], strides = [1, 1]} : vector<8x8xf32> to vector<8x1xf32>
    %80 = vector.extract_strided_slice %51 {offsets = [4, 0], sizes = [1, 256], strides = [1, 1]} : vector<8x256xf32> to vector<1x256xf32>
    %81 = vector.broadcast %79 : vector<8x1xf32> to vector<8x256xf32>
    %82 = vector.broadcast %80 : vector<1x256xf32> to vector<8x256xf32>
    %83 = arith.mulf %81, %82 : vector<8x256xf32>
    %84 = arith.addf %78, %83 : vector<8x256xf32>
    %85 = vector.extract_strided_slice %52 {offsets = [0, 5], sizes = [8, 1], strides = [1, 1]} : vector<8x8xf32> to vector<8x1xf32>
    %86 = vector.extract_strided_slice %51 {offsets = [5, 0], sizes = [1, 256], strides = [1, 1]} : vector<8x256xf32> to vector<1x256xf32>
    %87 = vector.broadcast %85 : vector<8x1xf32> to vector<8x256xf32>
    %88 = vector.broadcast %86 : vector<1x256xf32> to vector<8x256xf32>
    %89 = arith.mulf %87, %88 : vector<8x256xf32>
    %90 = arith.addf %84, %89 : vector<8x256xf32>
    %91 = math.tanh %90 : vector<8x256xf32>
    %c0_16 = arith.constant 0 : index
    %c0_17 = arith.constant 0 : index
    %92 = vector.load %arg6[%c0_16, %c0_17] : memref<1x4xf32, #tpu.memory_space<vmem>>, vector<1x4xf32>
    %c0_18 = arith.constant 0 : index
    %c0_19 = arith.constant 0 : index
    %93 = vector.load %arg7[%c0_18, %c0_19] : memref<1x1xf32, #tpu.memory_space<vmem>>, vector<1x1xf32>
    %94 = vector.extract_strided_slice %92 {offsets = [0, 0], sizes = [1, 1], strides = [1, 1]} : vector<1x4xf32> to vector<1x1xf32>
    %95 = vector.extract_strided_slice %91 {offsets = [0, 0], sizes = [1, 256], strides = [1, 1]} : vector<8x256xf32> to vector<1x256xf32>
    %96 = vector.broadcast %94 : vector<1x1xf32> to vector<1x256xf32>
    %97 = arith.mulf %96, %95 : vector<1x256xf32>
    %98 = vector.broadcast %93 : vector<1x1xf32> to vector<1x256xf32>
    %99 = arith.addf %98, %97 : vector<1x256xf32>
    %100 = vector.extract_strided_slice %92 {offsets = [0, 1], sizes = [1, 1], strides = [1, 1]} : vector<1x4xf32> to vector<1x1xf32>
    %101 = vector.extract_strided_slice %91 {offsets = [1, 0], sizes = [1, 256], strides = [1, 1]} : vector<8x256xf32> to vector<1x256xf32>
    %102 = vector.broadcast %100 : vector<1x1xf32> to vector<1x256xf32>
    %103 = arith.mulf %102, %101 : vector<1x256xf32>
    %104 = arith.addf %99, %103 : vector<1x256xf32>
    %105 = vector.extract_strided_slice %92 {offsets = [0, 2], sizes = [1, 1], strides = [1, 1]} : vector<1x4xf32> to vector<1x1xf32>
    %106 = vector.extract_strided_slice %91 {offsets = [2, 0], sizes = [1, 256], strides = [1, 1]} : vector<8x256xf32> to vector<1x256xf32>
    %107 = vector.broadcast %105 : vector<1x1xf32> to vector<1x256xf32>
    %108 = arith.mulf %107, %106 : vector<1x256xf32>
    %109 = arith.addf %104, %108 : vector<1x256xf32>
    %110 = vector.extract_strided_slice %92 {offsets = [0, 3], sizes = [1, 1], strides = [1, 1]} : vector<1x4xf32> to vector<1x1xf32>
    %111 = vector.extract_strided_slice %91 {offsets = [3, 0], sizes = [1, 256], strides = [1, 1]} : vector<8x256xf32> to vector<1x256xf32>
    %112 = vector.broadcast %110 : vector<1x1xf32> to vector<1x256xf32>
    %113 = arith.mulf %112, %111 : vector<1x256xf32>
    %114 = arith.addf %109, %113 : vector<1x256xf32>
    %115 = math.tanh %114 : vector<1x256xf32>
    %cst = arith.constant 5.000000e-01 : f32
    %116 = vector.broadcast %cst : f32 to vector<1x256xf32>
    %117 = arith.mulf %116, %115 : vector<1x256xf32>
    %cst_20 = arith.constant 5.000000e-01 : f32
    %118 = vector.broadcast %cst_20 : f32 to vector<1x256xf32>
    %119 = arith.addf %117, %118 : vector<1x256xf32>
    %c0_21 = arith.constant 0 : index
    %c0_22 = arith.constant 0 : index
    %120 = vector.load %arg8[%c0_21, %c0_22] : memref<1x256xf32, #tpu.memory_space<vmem>>, vector<1x256xf32>
    tpu.vector_store %arg8[%c0_21, %c0_22], %119 {strides = array<i32>} : memref<1x256xf32, #tpu.memory_space<vmem>>, vector<1x256xf32>,
    return
  }
  func.func @transform_0(%arg0: i32) -> (i32, i32) {
    %c0_i32 = arith.constant 0 : i32
    %c0_i32_0 = arith.constant 0 : i32
    return %c0_i32, %arg0 : i32, i32
  }
  func.func @transform_1(%arg0: i32) -> (i32, i32) {
    %c0_i32 = arith.constant 0 : i32
    %c0_i32_0 = arith.constant 0 : i32
    %c0_i32_1 = arith.constant 0 : i32
    return %c0_i32, %c0_i32_0 : i32, i32
  }
  func.func @transform_2(%arg0: i32) -> (i32, i32) {
    %c0_i32 = arith.constant 0 : i32
    %c0_i32_0 = arith.constant 0 : i32
    %c0_i32_1 = arith.constant 0 : i32
    return %c0_i32, %c0_i32_0 : i32, i32
  }
  func.func @transform_3(%arg0: i32) -> (i32, i32) {
    %c0_i32 = arith.constant 0 : i32
    %c0_i32_0 = arith.constant 0 : i32
    %c0_i32_1 = arith.constant 0 : i32
    return %c0_i32, %c0_i32_0 : i32, i32
  }
  func.func @transform_4(%arg0: i32) -> (i32, i32) {
    %c0_i32 = arith.constant 0 : i32
    %c0_i32_0 = arith.constant 0 : i32
    %c0_i32_1 = arith.constant 0 : i32
    return %c0_i32, %c0_i32_0 : i32, i32
  }
  func.func @transform_5(%arg0: i32) -> (i32, i32) {
    %c0_i32 = arith.constant 0 : i32
    %c0_i32_0 = arith.constant 0 : i32
    %c0_i32_1 = arith.constant 0 : i32
    return %c0_i32, %c0_i32_0 : i32, i32
  }
  func.func @transform_6(%arg0: i32) -> (i32, i32) {
    %c0_i32 = arith.constant 0 : i32
    %c0_i32_0 = arith.constant 0 : i32
    %c0_i32_1 = arith.constant 0 : i32
    return %c0_i32, %c0_i32_0 : i32, i32
  }
  func.func @transform_7(%arg0: i32) -> (i32, i32) {
    %c0_i32 = arith.constant 0 : i32
    %c0_i32_0 = arith.constant 0 : i32
    return %c0_i32, %arg0 : i32, i32
  }
}

</mosaic_0001>

<bundles_post_ra>
// kernel: tpu_custom_call.1
= control target key start
LH: loop header
LB: loop body
LE: loop exit
PB: predicated region body
PF: predicated region fallthrough
CT: control target
= control target key end

     0   :  { %s1074_s0 = inlined_call_operand.hbm [shape: f32[8,1000], index: 0, kind: input, shape index: {}]   ;;  %s1075_s1 = inlined_call_operand.vmem [shape: f32[8,8], index: 1, kind: input, shape index: {}]   ;;  %s1076_s2 = inlined_call_operand.vmem [shape: f32[8,1], index: 2, kind: input, shape index: {}]   ;;  %s1077_s3 = inlined_call_operand.vmem [shape: f32[8,8], index: 3, kind: input, shape index: {}]   ;;  %s1078_s4 = inlined_call_operand.vmem [shape: f32[8,1], index: 4, kind: input, shape index: {}]   ;;  %s1079_s5 = inlined_call_operand.vmem [shape: f32[1,4], index: 5, kind: input, shape index: {}]   ;;  %s1080_s6 = inlined_call_operand.<no memory space> [shape: f32[1,1], index: 6, kind: input, shape index: {}]   ;;  %s1081_s7 = inlined_call_operand.hbm [shape: f32[1,1000], index: 7, kind: output, shape index: {}]  }
   0x1   :  { %v12_v0 = vstv %s1080_s6 }
   0x2   :  { %13 = vst [vmem:[#allocation2] sm:$0x1] %v12_v0 }
   0x3   :  { %14 = vsyncpa [#allocation4], 0 }
   0x4   :  { %16 = vsyncpa [#allocation4 + $0x1], 0 }
   0x5   :  { %17 = vsyncpa [#allocation5], 0 }
   0x6   :  { %19 = vsyncpa [#allocation5 + $0x1], 0  ;;  %s923_s26 = smov 0   ;;  %s925_s27 = smov 0  }
   0x7   :  { %s927_s28 = smov 0   ;;  %s929_s29 = smov 0  }
   0x8 LB: > { %s944_s6 = sadd.s32 4294967295, %s870_s29   ;;  %s666_s30 = sadd.s32 4294967294, %s870_s29   ;;  %s870_s29 = sphi %s929_s29, %s1090_s29   ;;  %s866_s28 = sphi %s927_s28, %s1089_s28   ;;  %s862_s27 = sphi %s925_s27, %s1088_s27   ;;  %s858_s26 = sphi %s923_s26, %s1087_s26  }
   0x9   : > { %s948_s8 = sadd.s32 1, %s870_s29   ;;  %s32_s9 = sadd.s32 1, %s866_s28 }
   0xa   : > { %s29_s10 = ssub.s32 %s870_s29, %s948_s8  ;;  %p39_p0 = scmp.ne.s32.totalorder %s866_s28, %s862_s27 }
   0xb   : > { %p30_p1 = scmp.eq.s32.totalorder %s29_s10, 0  ;;  %p40_p2 = scmp.eq.s32.totalorder %s870_s29, 0 }
   0xc   : > { %p45_p3 = scmp.ne.s32.totalorder %s862_s27, %s858_s26  ;;  %p46_p4 = scmp.eq.s32.totalorder %s944_s6, 0 }
   0xd   : > { %s960_s11 = scalar_select %p30_p1, %s866_s28, %s32_s9  }
   0xe   : > { %p962_p5 = por %p40_p2, %p39_p0  ;;  %p966_p6 = por %p46_p4, %p45_p3 }
   0xf   : > { %p195_p7 = scmp.eq.s32.totalorder %s944_s6, 3  ;;  %p201_p8 = scmp.eq.s32.totalorder %s666_s30, 3 }
  0x10   : > { %p699_p9 = scmp.lt.s32.totalorder %s870_s29, 4  ;;  %s239_s16 = sand.u32 1, %s866_s28  }
  0x11   : > { %p972_p10 = por %p195_p7, %p39_p0  ;;  %p976_p11 = por %p201_p8, %p45_p3 }
  0x12   : > { %s686_s17 = sshll.u32 %s870_s29, 4  ;;  %s669_s18 = sshll.u32 %s239_s16, 4 }
  0x13   : > { %s248_s21 = scalar_lea.hbm %s1074_s0, %s686_s17  ;;  %s243_s23 = scalar_lea.vmem [#allocation3], %s669_s18 }
  0x14   : > { %s250_s22 = sshll.u32 %s248_s21, 4  ;;  %s252_s24 = sshll.u32 %s243_s23, 4  ;;  %s251_s22 = int_to_ptr.hbm [resolvable:$true] %s250_s22  ;;  %s253_s24 = int_to_ptr.vmem [resolvable:$true] %s252_s24 }
  0x15   : > { %p987_p12 = pnand %p699_p9, %p962_p5  ;;  %p672_p13 = scmp.ge.s32.totalorder %s870_s29, 1 }
  0x16   : > { %p257_p0 = scmp.lt.s32.totalorder %s870_s29, 5  ;;  %s240_s30 = scalar_lea.sflag [#allocation4], %s239_s16 }
  0x17   : > { %s774_s9 = sshra.s32 %s251_s22, 4  ;;  %p778_p2 = pneg %p987_p12  ;;  %s775_s9 = int_to_ptr.hbm [resolvable:$true] %s774_s9 }
  0x18   : > { %s776_s10 = scalar_lea.hbm %s775_s9, 16  ;;  %s781_s12 = scalar_lea.hbm %s1074_s0, 64 }
  0x19   : > { %p777_p1 = scmp.ne.s32.totalorder %s775_s9, %s776_s10  ;;  %p782_p5 = scmp.lt.s32.totalorder %s775_s9, %s1074_s0 }
  0x1a   : > { %p783_p7 = scmp.lt.s32.totalorder %s781_s12, %s776_s10 }
  0x1b   : > { %p779_p3 = pnand %p778_p2, %p777_p1 }
  0x1c   : > { %p784_p8 = por %p783_p7, %p782_p5 }
  0x1d   : > { %p780_p4 = pneg %p779_p3 }
  0x1f   : > { %p785_p9 = pnand %p784_p8, %p780_p4 }
  0x21   : > { %788 = shalt.err (!%p785_p9)
}
  0x22   : > { %694 = dma.hbm_to_vmem [thread:$0]  (!%p987_p12), %s251_s22, 256, %s253_s24, %s240_s30  }
  0x23   : > { %p258_p1 = pnand %p672_p13, %p257_p0 }
  0x24   : > { %s1008_s16 = sand.u32 (!%p258_p1), 1, %s862_s27  }
  0x25   : > { %261 = sbr.rel (%p258_p1) target bundleno = 251 (0xfb), region = 48  ;;  %s673_s21 = sshll.u32 (!%p258_p1), %s1008_s16, 4 }
  0x26   : > { %s264_s23 = scalar_lea.sflag (!%p258_p1), [#allocation4], %s1008_s16  ;;  %s1012_s9 = scalar_lea.vmem (!%p258_p1), [#allocation3], %s673_s21 }
  0x2a   : > { %849 = dma.done.wait (%p966_p6), %s264_s23, 256  }
  0x2b   : > { %851 = vsyncadd (%p966_p6), %s264_s23, 4294967040  ;;  %v872_v1 = vmov 1   ;;  %v873_v2 = vmov 0   ;;  %v874_v3 = vmov 3   ;;  %v301_v4 = vld [vmem:[%s1075_s1] sm:$0xff]  ;;  %v875_v6 = vmov 2  }
  0x2c   : > { %742 = vset.pattern.permute.xlu1 %v872_v1  ;;  %741 = vset.pattern.permute.xlu0 %v873_v2  ;;  %v302_v5 = vld [vmem:[%s1076_s2] sm:$0xff]  ;;  %v876_v7 = vmov 4   ;;  %v877_v8 = vmov 5   ;;  %v878_v9 = vmov 6   ;;  %v879_v10 = vmov 7   ;;  %s674_s20 = sshll.u32 %s1008_s16, 1 }
  0x2d   : > { %744 = vset.pattern.permute.xlu2 %v874_v3  ;;  %326 = vperm.xlu1 %742, %v301_v4   ;;  %v430_v11 = vld [vmem:[%s1077_s3] sm:$0xff]  ;;  %s683_s21 = sshll.u32 %s944_s6, 1  ;;  %s298_s24 = scalar_lea.vmem [#allocation6], %s674_s20  ;;  %vm572_vm0 = vcmask 1040384  }
  0x2e   : > { %306 = vperm.xlu0 %741, %v301_v4   ;;  %356 = vperm.xlu2 %744, %v301_v4   ;;  %v431_v12 = vld [vmem:[%s1078_s4] sm:$0xff]  ;;  %s591_s22 = scalar_lea.hbm %s1081_s7, %s683_s21  ;;  %s593_s25 = sshll.u32 %s298_s24, 4  ;;  %s594_s25 = int_to_ptr.vmem [resolvable:$true] %s593_s25 }
  0x2f   : > { %v500_v13 = vld [vmem:[%s1079_s5] sm:$0x1]  ;;  %v303_v16 = vld [vmem:[%s1012_s9] ss:$8 sm:$0x3]  ;;  %s595_s30 = sshll.u32 %s591_s22, 4  ;;  %s596_s30 = int_to_ptr.hbm [resolvable:$true] %s595_s30 }
  0x30   : > { %v501_v14 = vld [vmem:[#allocation2] sm:$0x1]  ;;  %v310_v19 = vperm.slane %v303_v16, 0  ;;  %v311_v20 = vperm.slane %v303_v16, 1  ;;  %s581_s6 = scalar_lea.sflag [#allocation5], %s1008_s16  ;;  %s818_s13 = sshra.s32 %s596_s30, 4  ;;  %s819_s13 = int_to_ptr.hbm [resolvable:$true] %s818_s13 }
  0x31   : > { %v675_v22 = vld [vmem:[%s1012_s9 + $0x1] ss:$8 sm:$0x3]  ;;  %v676_v23 = vld [vmem:[%s1012_s9 + $0x2] ss:$8 sm:$0x3]  ;;  %p825_p0 = scmp.lt.s32.totalorder %s819_s13, %s1081_s7 }
  0x32   : > { %v677_v24 = vld [vmem:[%s1012_s9 + $0x3] ss:$8 sm:$0x3]  ;;  %v330_v25 = vperm.slane %v675_v22, 0  ;;  %v331_v26 = vperm.slane %v675_v22, 1  ;;  %v345_v29 = vperm.slane %v676_v23, 0 }
  0x33   : > { %v346_v30 = vperm.slane %v676_v23, 1  ;;  %v678_v31 = vld [vmem:[%s1012_s9 + $0x4] ss:$8 sm:$0x3]  ;;  %v360_v32 = vperm.slane %v677_v24, 0  ;;  %v361_v33 = vperm.slane %v677_v24, 1 }
  0x34   : > { %v375_v40 = vperm.slane %v678_v31, 0  ;;  %v376_v41 = vperm.slane %v678_v31, 1  ;;  %v679_v47 = vld [vmem:[%s1012_s9 + $0x5] ss:$8 sm:$0x3]  ;;  %s820_s10 = scalar_lea.hbm %s819_s13, 2 }
  0x35   : > { %743 = vset.pattern.permute.xlu1 %v875_v6  ;;  %v680_v48 = vld [vmem:[%s1012_s9 + $0x6] ss:$8 sm:$0x3]  ;;  %v681_v53 = vld [vmem:[%s1012_s9 + $0x7] ss:$8 sm:$0x3]  ;;  %p821_p6 = scmp.ne.s32.totalorder %s819_s13, %s820_s10 }
  0x36   : > { %318 = vperm.xlu0 %741, %v302_v5   ;;  %341 = vperm.xlu1 %743, %v301_v4   ;;  %v390_v54 = vperm.slane %v679_v47, 0  ;;  %v391_v55 = vperm.slane %v679_v47, 1  ;;  %v405_v56 = vperm.slane %v680_v48, 0  ;;  %v406_v57 = vperm.slane %v680_v48, 1  ;;  %s824_s12 = scalar_lea.hbm %s1081_s7, 8 }
  0x37   : > { %745 = vset.pattern.permute.xlu2 %v876_v7  ;;  %v420_v62 = vperm.slane %v681_v53, 0  ;;  %v421_v63 = vperm.slane %v681_v53, 1  ;;  %p822_p12 = pnand %p821_p6, %p972_p10  ;;  %p826_p2 = scmp.lt.s32.totalorder %s824_s12, %s820_s10 }
  0x38   : > { %371 = vperm.xlu2 %745, %v301_v4  }
  0x39   : > { %p823_p13 = pneg %p822_p12  ;;  %p827_p3 = por %p826_p2, %p825_p0 }
  0x3b   : > { %p828_p4 = pnand %p827_p3, %p823_p13 }
  0x3e   : > { %746 = vset.pattern.permute.xlu0 %v877_v8  ;;  %747 = vset.pattern.permute.xlu1 %v878_v9 }
  0x3f   : > { %386 = vperm.xlu0 %746, %v301_v4   ;;  %401 = vperm.xlu1 %747, %v301_v4  }
  0x40   : > { %748 = vset.pattern.permute.xlu2 %v879_v10 }
  0x41   : > { %416 = vperm.xlu2 %748, %v301_v4  }
  0x47   : > { %751 = vset.pattern.permute.xlu0 %v872_v1  ;;  %749 = vset.pattern.permute.xlu1 %v873_v2 }
  0x48   : > { %449 = vperm.xlu0 %751, %v430_v11   ;;  %434 = vperm.xlu1 %749, %v430_v11  }
  0x49   : > { %750 = vset.pattern.permute.xlu2 %v873_v2 }
  0x4a   : > { %443 = vperm.xlu2 %750, %v431_v12  }
  0x50   : > { %756 = vset.pattern.permute.xlu0 %v873_v2  ;;  %752 = vset.pattern.permute.xlu1 %v875_v6 }
  0x51   : > { %504 = vperm.xlu0 %756, %v500_v13   ;;  %459 = vperm.xlu1 %752, %v430_v11  }
  0x52   : > { %753 = vset.pattern.permute.xlu2 %v874_v3 }
  0x53   : > { %469 = vperm.xlu2 %753, %v430_v11  }
  0x59   : > { %761 = vset.pattern.permute.xlu0 %v874_v3  ;;  %754 = vset.pattern.permute.xlu1 %v876_v7 }
  0x5a   : > { %479 = vperm.xlu1 %754, %v430_v11  }
  0x5b   : > { %755 = vset.pattern.permute.xlu2 %v877_v8 }
  0x5c   : > { %489 = vperm.xlu2 %755, %v430_v11  }
  0x62   : > { %757 = vset.pattern.permute.xlu1 %v872_v1 }
  0x63   : > { %519 = vperm.xlu1 %757, %v500_v13  }
  0x64   : > { %758 = vset.pattern.permute.xlu2 %v873_v2 }
  0x65   : > { %512 = vperm.xlu2 %758, %v501_v14  }
  0x6b   : > { %759 = vset.pattern.permute.xlu1 %v875_v6 }
  0x6c   : > { %534 = vperm.xlu1 %759, %v500_v13  }
  0x6d   : > { %760 = vset.pattern.permute.xlu2 %v874_v3 }
  0x6e   : > { %549 = vperm.xlu2 %760, %v500_v13  }
  0x88   : > { %v357_v15 = vpop.permute.xlu2 %356 }
  0x89   : > { %v364_v49 = vmul.f32 %v360_v32, %v357_v15  ;;  %v365_v50 = vmul.f32 %v361_v33, %v357_v15 }
  0x92   : > { %v372_v21 = vpop.permute.xlu2 %371 }
  0x93   : > { %v379_v58 = vmul.f32 %v375_v40, %v372_v21  ;;  %v380_v59 = vmul.f32 %v376_v41, %v372_v21 }
  0x9b   : > { %v417_v46 = vpop.permute.xlu2 %416 }
  0x9c   : > { %v424_v8 = vmul.f32 %v420_v62, %v417_v46  ;;  %v425_v9 = vmul.f32 %v421_v63, %v417_v46 }
  0x9f   : > { %v327_v17 = vpop.permute.xlu1 %326 }
  0xa0   : > { %v307_v18 = vpop.permute.xlu0 %306  ;;  %v334_v35 = vmul.f32 %v330_v25, %v327_v17  ;;  %v335_v36 = vmul.f32 %v331_v26, %v327_v17 }
  0xa1   : > { %v314_v27 = vmul.f32 %v310_v19, %v307_v18  ;;  %v315_v28 = vmul.f32 %v311_v20, %v307_v18 }
  0xa4   : > { %v444_v12 = vpop.permute.xlu2 %443 }
  0xa8   : > { %v319_v34 = vpop.permute.xlu0 %318  ;;  %v342_v39 = vpop.permute.xlu1 %341 }
  0xa9   : > { %v321_v37 = vadd.f32 %v319_v34, %v314_v27  ;;  %v322_v38 = vadd.f32 %v319_v34, %v315_v28  ;;  %v349_v42 = vmul.f32 %v345_v29, %v342_v39  ;;  %v350_v43 = vmul.f32 %v346_v30, %v342_v39 }
  0xab   : > { %v336_v44 = vadd.f32 %v334_v35, %v321_v37  ;;  %v337_v45 = vadd.f32 %v335_v36, %v322_v38 }
  0xad   : > { %v351_v51 = vadd.f32 %v349_v42, %v336_v44  ;;  %v352_v52 = vadd.f32 %v350_v43, %v337_v45  ;;  %v470_v18 = vpop.permute.xlu2 %469 }
  0xaf   : > { %v366_v60 = vadd.f32 %v364_v49, %v351_v51  ;;  %v367_v61 = vadd.f32 %v365_v50, %v352_v52 }
  0xb1   : > { %v381_v0 = vadd.f32 %v379_v58, %v366_v60  ;;  %v382_v1 = vadd.f32 %v380_v59, %v367_v61  ;;  %v387_v2 = vpop.permute.xlu0 %386  ;;  %v402_v5 = vpop.permute.xlu1 %401 }
  0xb2   : > { %v394_v3 = vmul.f32 %v390_v54, %v387_v2  ;;  %v395_v4 = vmul.f32 %v391_v55, %v387_v2  ;;  %v409_v6 = vmul.f32 %v405_v56, %v402_v5  ;;  %v410_v7 = vmul.f32 %v406_v57, %v402_v5 }
  0xb4   : > { %v396_v10 = vadd.f32 %v394_v3, %v381_v0  ;;  %v397_v11 = vadd.f32 %v395_v4, %v382_v1 }
  0xb6   : > { %v411_v13 = vadd.f32 %v409_v6, %v396_v10  ;;  %v412_v14 = vadd.f32 %v410_v7, %v397_v11  ;;  %v490_v41 = vpop.permute.xlu2 %489 }
  0xb8   : > { %v426_v15 = vadd.f32 %v424_v8, %v411_v13  ;;  %v427_v16 = vadd.f32 %v425_v9, %v412_v14 }
  0xba   : > { %762 = vtanh.f32 %v426_v15  ;;  %v435_v17 = vpop.permute.xlu1 %434  ;;  %v450_v25 = vpop.permute.xlu0 %449 }
  0xbb   : > { %764 = vtanh.f32 %v427_v16 }
  0xbf   : > { %v513_v59 = vpop.permute.xlu2 %512 }
  0xc0   : > { %v763_v19 = vpop.eup %762  ;;  %v515_v9 = vperm.slane %v513_v59, 0 }
  0xc1   : > { %v765_v20 = vpop.eup %764  ;;  %v437_v21 = vperm.slane %v763_v19, 0  ;;  %v452_v22 = vperm.slane %v763_v19, 1  ;;  %v462_v33 = vperm.slane %v763_v19, 2  ;;  %v472_v35 = vperm.slane %v763_v19, 3 }
  0xc2   : > { %v438_v23 = vperm.slane %v765_v20, 0  ;;  %v453_v24 = vperm.slane %v765_v20, 1  ;;  %v463_v34 = vperm.slane %v765_v20, 2  ;;  %v473_v37 = vperm.slane %v765_v20, 3 }
  0xc3   : > { %v439_v26 = vmul.f32 %v437_v21, %v435_v17  ;;  %v460_v28 = vpop.permute.xlu1 %459  ;;  %v454_v30 = vmul.f32 %v452_v22, %v450_v25  ;;  %v492_v44 = vperm.slane %v763_v19, 5  ;;  %v493_v45 = vperm.slane %v765_v20, 5  ;;  %v505_v62 = vpop.permute.xlu0 %504 }
  0xc4   : > { %v440_v27 = vmul.f32 %v438_v23, %v435_v17  ;;  %v455_v32 = vmul.f32 %v453_v24, %v450_v25  ;;  %v464_v39 = vmul.f32 %v462_v33, %v460_v28  ;;  %v465_v40 = vmul.f32 %v463_v34, %v460_v28 }
  0xc5   : > { %v446_v29 = vadd.f32 %v444_v12, %v439_v26  ;;  %v474_v46 = vmul.f32 %v472_v35, %v470_v18  ;;  %v475_v47 = vmul.f32 %v473_v37, %v470_v18  ;;  %v482_v48 = vperm.slane %v763_v19, 4 }
  0xc6   : > { %v447_v31 = vadd.f32 %v444_v12, %v440_v27  ;;  %v483_v49 = vperm.slane %v765_v20, 4  ;;  %v494_v55 = vmul.f32 %v492_v44, %v490_v41  ;;  %v495_v56 = vmul.f32 %v493_v45, %v490_v41 }
  0xc7   : > { %v456_v36 = vadd.f32 %v454_v30, %v446_v29  ;;  %v507_v0 = vperm.slane %v505_v62, 0  ;;  %v575_v35 = vlaneseq }
  0xc8   : > { %v457_v38 = vadd.f32 %v455_v32, %v447_v31  ;;  %v550_v5 = vpop.permute.xlu2 %549 }
  0xc9   : > { %v466_v42 = vadd.f32 %v464_v39, %v456_v36  ;;  %v552_v10 = vperm.slane %v550_v5, 0  ;;  %vm577_vm1 = vcmp.lt.s32.totalorder %v575_v35, 256 }
  0xca   : > { %v467_v43 = vadd.f32 %v465_v40, %v457_v38 }
  0xcb   : > { %v476_v51 = vadd.f32 %v474_v46, %v466_v42 }
  0xcc   : > { %v480_v50 = vpop.permute.xlu1 %479  ;;  %v477_v52 = vadd.f32 %v475_v47, %v467_v43 }
  0xcd   : > { %v484_v53 = vmul.f32 %v482_v48, %v480_v50  ;;  %v485_v54 = vmul.f32 %v483_v49, %v480_v50 }
  0xcf   : > { %v486_v57 = vadd.f32 %v484_v53, %v476_v51  ;;  %v487_v58 = vadd.f32 %v485_v54, %v477_v52 }
  0xd1   : > { %v496_v60 = vadd.f32 %v494_v55, %v486_v57  ;;  %v497_v61 = vadd.f32 %v495_v56, %v487_v58 }
  0xd3   : > { %766 = vtanh.f32 %v496_v60 }
  0xd4   : > { %768 = vtanh.f32 %v497_v61 }
  0xd5   : > { %v520_v63 = vpop.permute.xlu1 %519 }
  0xd6   : > { %v522_v1 = vperm.slane %v520_v63, 0 }
  0xd9   : > { %v767_v2 = vpop.eup %766 }
  0xda   : > { %v769_v3 = vpop.eup %768  ;;  %v523_v4 = vmul.f32 %v767_v2, %v522_v1  ;;  %v508_v7 = vmul.f32 %v767_v2, %v507_v0  ;;  %v553_v17 = vmul.f32 %v767_v2, %v552_v10 }
  0xdb   : > { %v524_v6 = vmul.f32 %v769_v3, %v522_v1  ;;  %v509_v8 = vmul.f32 %v769_v3, %v507_v0  ;;  %v554_v18 = vmul.f32 %v769_v3, %v552_v10 }
  0xdc   : > { %v527_v11 = vrot.slane %v523_v4, 1  ;;  %v516_v14 = vadd.f32 %v515_v9, %v508_v7  ;;  %v557_v25 = vrot.slane %v553_v17, 3 }
  0xdd   : > { %v528_v13 = vrot.slane %v524_v6, 1  ;;  %v517_v15 = vadd.f32 %v515_v9, %v509_v8  ;;  %v558_v26 = vrot.slane %v554_v18, 3 }
  0xde   : > { %v535_v12 = vpop.permute.xlu1 %534  ;;  %v531_v21 = vadd.f32 %v527_v11, %v516_v14 }
  0xdf   : > { %v537_v16 = vperm.slane %v535_v12, 0  ;;  %v532_v22 = vadd.f32 %v528_v13, %v517_v15 }
  0xe1   : > { %v538_v19 = vmul.f32 %v767_v2, %v537_v16  ;;  %v539_v20 = vmul.f32 %v769_v3, %v537_v16 }
  0xe3   : > { %v542_v23 = vrot.slane %v538_v19, 2  ;;  %v543_v24 = vrot.slane %v539_v20, 2 }
  0xe5   : > { %v546_v27 = vadd.f32 %v542_v23, %v531_v21  ;;  %v547_v28 = vadd.f32 %v543_v24, %v532_v22 }
  0xe7   : > { %v561_v29 = vadd.f32 %v557_v25, %v546_v27  ;;  %v562_v30 = vadd.f32 %v558_v26, %v547_v28 }
  0xe9   : > { %770 = vtanh.f32 %v561_v29 }
  0xea   : > { %772 = vtanh.f32 %v562_v30 }
  0xef   : > { %v771_v31 = vpop.eup %770 }
  0xf0   : > { %v773_v32 = vpop.eup %772  ;;  %v565_v33 = vmul.f32 0.5, %v771_v31 }
  0xf1   : > { %v566_v34 = vmul.f32 0.5, %v773_v32 }
  0xf2   : > { %v567_v37 = vadd.f32 0.5, %v565_v33 }
  0xf3   : > { %v568_v36 = vadd.f32 0.5, %v566_v34 }
  0xf5   : > { %v571_v38 = vrot.slane %v568_v36, 7 }
  0xf7   : > { %v573_v39 = vsel %vm572_vm0, %v567_v37, %v571_v38 }
  0xf8   : > { %579 = vst.msk [vmem:[%s298_s24] sm:$0x3] %vm577_vm1, %v573_v39 }
  0xf9   : > { %831 = shalt.err (!%p828_p4)
}
  0xfa   : > { %689 = dma.vmem_to_hbm [thread:$0]  (%p972_p10), %s594_s25, 32, %s596_s30, %s581_s6  }
  0xfb PF: > { %p700_p5 = scmp.ge.s32.totalorder %s870_s29, 2  ;;  %s607_s16 = sand.u32 1, %s858_s26  }
  0xfc   : > { %s608_s21 = scalar_lea.sflag [#allocation5], %s607_s16 }
  0xfd   : > { %p696_p7 = pnand %p700_p5, %p976_p11 }
  0xff   : > { %p697_p8 = pneg %p696_p7 }
 0x101   : > { %853 = dma.done.wait (%p697_p8), %s608_s21, 32  }
 0x102   : > { %855 = vsyncadd (%p697_p8), %s608_s21, 4294967264  ;;  %p22_p9 = scmp.ge.s32.totalorder %s948_s8, 6   ;;  %s1087_s26 = smov %s862_s27 }
 0x103   : > { %s1088_s27 = smov %s866_s28  ;;  %s1089_s28 = smov %s960_s11 }
 0x104   : > { %s1090_s29 = smov %s948_s8  ;;  %24 = sbr.rel (!%p22_p9) target bundleno = 8 (0x8), region = 100 }
 0x109   :  { %614 = vsyncpa [#allocation4], 1 }
 0x10a   :  { %616 = vsyncpa [#allocation4 + $0x1], 1 }
 0x10b   :  { %617 = vsyncpa [#allocation5], 1 }
 0x10c   :  { %619 = vsyncpa [#allocation5 + $0x1], 1 }

</bundles_post_ra>
